<compile_context>
chip_gen: v7x
topology: tpu7x:2x2x1
jax: 0.10.0
libtpu: 0.0.40
codegen_flags: <defaults>
</compile_context>

<pallas_src>
import functools

import jax
import jax.numpy as jnp
from jax import lax
from jax.experimental import pallas as pl
from jax.experimental.pallas import tpu as pltpu


# ----------------------------- Pallas kernels ------------------------------


def _gram_kernel(feat_ref, g_ref, *, inv_norm):
    """Accumulate G += X_tile @ X_tile^T over the K grid axis; scale at the end."""
    k = pl.program_id(0)

    @pl.when(k == 0)
    def _():
        g_ref[...] = jnp.zeros_like(g_ref)

    f = feat_ref[...]  # (M, TK), native dtype — MXU contracts dim 1 of both sides
    g_ref[...] += lax.dot_general(
        f, f,
        dimension_numbers=(((1,), (1,)), ((), ())),
        preferred_element_type=jnp.float32,
    )

    @pl.when(k == pl.num_programs(0) - 1)
    def _():
        g_ref[...] = g_ref[...] * inv_norm


def _style_loss_kernel(feat_ref, target_ref, loss_ref, acc_ref, *, inv_norm):
    """loss = mean((gram(X) - target_G)^2); gram accumulated over the K grid axis."""
    k = pl.program_id(0)

    @pl.when(k == 0)
    def _():
        acc_ref[...] = jnp.zeros_like(acc_ref)

    f = feat_ref[...]  # (M, TK), native dtype
    acc_ref[...] += lax.dot_general(
        f, f,
        dimension_numbers=(((1,), (1,)), ((), ())),
        preferred_element_type=jnp.float32,
    )

    @pl.when(k == pl.num_programs(0) - 1)
    def _():
        g = acc_ref[...] * inv_norm
        diff = g - target_ref[...].astype(jnp.float32)
        loss_ref[0] = jnp.mean(diff * diff)


# ------------------------------ JAX wrappers --------------------------------


def _flatten_nchw(x):
    a, b, c, d = x.shape
    return x.reshape(a * b, c * d), float(a * b * c * d)


def _pick_tk(k_dim):
    """Largest lane-aligned K tile that divides K (keeps DMA near HBM roofline)."""
    for cand in (2048, 1024, 512, 256, 128):
        if k_dim % cand == 0:
            return cand
    return k_dim  # small / unaligned K: single step, whole row fits in VMEM


def _compiler_params():
    return pltpu.CompilerParams(
        dimension_semantics=("arbitrary",),          # K axis is a reduction
        vmem_limit_bytes=48 * 1024 * 1024,           # explicit cap; safe on v5e..v7x
    )


def gram_matrix_pallas(x, *, tk=None):
    """Pallas equivalent of torch gram_matrix for an NCHW tensor."""
    feats, norm = _flatten_nchw(x)
    m, k_dim = feats.shape
    tk = _pick_tk(k_dim) if tk is None else tk
    nk = pl.cdiv(k_dim, tk)
    return pl.pallas_call(
        functools.partial(_gram_kernel, inv_norm=1.0 / norm),
        out_shape=jax.ShapeDtypeStruct((m, m), jnp.float32),
        grid_spec=pltpu.PrefetchScalarGridSpec(
            num_scalar_prefetch=0,
            grid=(nk,),
            in_specs=[pl.BlockSpec((m, tk), lambda k: (0, k))],
            out_specs=pl.BlockSpec((m, m), lambda k: (0, 0)),   # resident accumulator
        ),
        compiler_params=_compiler_params(),
        cost_estimate=pl.CostEstimate(
            flops=2 * m * m * k_dim,
            transcendentals=0,
            bytes_accessed=feats.size * feats.dtype.itemsize + m * m * 4,
        ),
    )(feats)


def style_loss_forward(x, target_g, *, tk=None):
    """Forward pass of StyleLoss: returns (input, loss)."""
    feats, norm = _flatten_nchw(x)
    m, k_dim = feats.shape
    tk = _pick_tk(k_dim) if tk is None else tk
    nk = pl.cdiv(k_dim, tk)
    loss = pl.pallas_call(
        functools.partial(_style_loss_kernel, inv_norm=1.0 / norm),
        out_shape=jax.ShapeDtypeStruct((1,), jnp.float32),
        grid_spec=pltpu.PrefetchScalarGridSpec(
            num_scalar_prefetch=0,
            grid=(nk,),
            in_specs=[
                pl.BlockSpec((m, tk), lambda k: (0, k)),        # streamed K tiles
                pl.BlockSpec((m, m), lambda k: (0, 0)),         # resident target G
            ],
            out_specs=pl.BlockSpec(memory_space=pltpu.MemorySpace.SMEM),
            scratch_shapes=[pltpu.VMEM((m, m), jnp.float32)],   # gram accumulator
        ),
        compiler_params=_compiler_params(),
        cost_estimate=pl.CostEstimate(
            flops=2 * m * m * k_dim,
            transcendentals=0,
            bytes_accessed=feats.size * feats.dtype.itemsize + m * m * 8,
        ),
    )(feats, target_g)
    # Module returns its input unchanged; loss is the computed side value.
    return x, loss[0]


class StyleLoss:
    """JAX/Pallas mirror of the PyTorch StyleLoss module."""

    def __init__(self, target_feature, *, tk=None):
        # target gram is fixed at init (detached in PyTorch).
        self._tk = tk
        self.target = gram_matrix_pallas(target_feature, tk=tk)
        self.loss = None

    def __call__(self, x):
        out, self.loss = style_loss_forward(x, self.target, tk=self._tk)
        return out


# ---------------------------------- main ------------------------------------


if __name__ == "__main__":
    # Small NCHW conv-feature shapes: a=2, b=4, c=d=16
    # -> features matrix is (8, 256).  tk=128 forces a 2-step K reduction so the
    #    init / accumulate / finalize grid path is exercised even at toy size.
    a, b, c, d = 2, 4, 16, 16
    key = jax.random.PRNGKey(0)
    k_tgt, k_in = jax.random.split(key)
    target_feature = jax.random.normal(k_tgt, (a, b, c, d), dtype=jnp.float32)
    x = jax.random.normal(k_in, (a, b, c, d), dtype=jnp.float32)

    module = StyleLoss(target_feature, tk=128)
    out = module(x)
    out = jax.block_until_ready(out)
    loss = jax.block_until_ready(module.loss)

    # Pure-JAX reference check.
    def gram_ref(t):
        f = t.reshape(a * b, c * d)
        return (f @ f.T) / (a * b * c * d)

    ref_loss = jnp.mean((gram_ref(x) - gram_ref(target_feature)) ** 2)
    assert jnp.allclose(out, x), "forward must return its input unchanged"
    assert jnp.allclose(loss, ref_loss, rtol=1e-5, atol=1e-6), (loss, ref_loss)

    print("KERNEL_OK")
</pallas_src>

<mosaic_0001>
module attributes {stable_mosaic.version = 11 : i64} {
  func.func @_gram_kernel(%arg0: i32, %arg1: memref<8x128xf32, #tpu.memory_space<vmem>>, %arg2: memref<8x8xf32, #tpu.memory_space<vmem>>) attributes {dimension_semantics = [#tpu.dimension_semantics<arbitrary>], iteration_bounds = array<i64: 2>, scalar_prefetch = 0 : i64, scratch_operands = 0 : i64, tpu.core_type = #tpu.core_type<tc>, window_params = [{transform_indices = @transform_0, window_bounds = array<i64: 8, 128>}, {pipeline_mode = #tpu.pipeline_mode<synchronous>, transform_indices = @transform_1, window_bounds = array<i64: 8, 8>}]} {
    %c0_i32 = arith.constant 0 : i32
    %0 = arith.cmpi eq, %arg0, %c0_i32 : i32
    %1 = arith.extui %0 : i1 to i32
    %c0_i32_0 = arith.constant 0 : i32
    %2 = arith.cmpi ne, %1, %c0_i32_0 : i32
    scf.if %2 {
      %cst_7 = arith.constant 0.000000e+00 : f32
      %11 = vector.broadcast %cst_7 : f32 to vector<8x8xf32>
      %c0_8 = arith.constant 0 : index
      %c0_9 = arith.constant 0 : index
      %12 = vector.load %arg2[%c0_8, %c0_9] : memref<8x8xf32, #tpu.memory_space<vmem>>, vector<8x8xf32>
      tpu.vector_store %arg2[%c0_8, %c0_9], %11 {strides = array<i32>} : memref<8x8xf32, #tpu.memory_space<vmem>>, vector<8x8xf32>,
    } else {
    }
    %c0 = arith.constant 0 : index
    %c0_1 = arith.constant 0 : index
    %3 = vector.load %arg1[%c0, %c0_1] : memref<8x128xf32, #tpu.memory_space<vmem>>, vector<8x128xf32>
    %c0_2 = arith.constant 0 : index
    %c0_3 = arith.constant 0 : index
    %4 = vector.load %arg2[%c0_2, %c0_3] : memref<8x8xf32, #tpu.memory_space<vmem>>, vector<8x8xf32>
    %cst = arith.constant dense<0.000000e+00> : vector<8x8xf32>
    %5 = tpu.matmul %3, %3, %cst {dimension_numbers = #tpu.dot_dimension_numbers<[1], [1], [0], [0], [0, 0, 1, 0], [], []>} : vector<8x128xf32>, vector<8x128xf32>, vector<8x8xf32> -> vector<8x8xf32>
    %6 = arith.addf %4, %5 : vector<8x8xf32>
    %c0_4 = arith.constant 0 : index
    %c0_5 = arith.constant 0 : index
    %7 = vector.load %arg2[%c0_4, %c0_5] : memref<8x8xf32, #tpu.memory_space<vmem>>, vector<8x8xf32>
    tpu.vector_store %arg2[%c0_4, %c0_5], %6 {strides = array<i32>} : memref<8x8xf32, #tpu.memory_space<vmem>>, vector<8x8xf32>,
    %c1_i32 = arith.constant 1 : i32
    %8 = arith.cmpi eq, %arg0, %c1_i32 : i32
    %9 = arith.extui %8 : i1 to i32
    %c0_i32_6 = arith.constant 0 : i32
    %10 = arith.cmpi ne, %9, %c0_i32_6 : i32
    scf.if %10 {
      %c0_7 = arith.constant 0 : index
      %c0_8 = arith.constant 0 : index
      %11 = vector.load %arg2[%c0_7, %c0_8] : memref<8x8xf32, #tpu.memory_space<vmem>>, vector<8x8xf32>
      %cst_9 = arith.constant 4.8828125E-4 : f32
      %12 = vector.broadcast %cst_9 : f32 to vector<8x8xf32>
      %13 = arith.mulf %11, %12 : vector<8x8xf32>
      %c0_10 = arith.constant 0 : index
      %c0_11 = arith.constant 0 : index
      %14 = vector.load %arg2[%c0_10, %c0_11] : memref<8x8xf32, #tpu.memory_space<vmem>>, vector<8x8xf32>
      tpu.vector_store %arg2[%c0_10, %c0_11], %13 {strides = array<i32>} : memref<8x8xf32, #tpu.memory_space<vmem>>, vector<8x8xf32>,
    } else {
    }
    return
  }
  func.func @transform_0(%arg0: i32) -> (i32, i32) {
    %c0_i32 = arith.constant 0 : i32
    %c0_i32_0 = arith.constant 0 : i32
    return %c0_i32, %arg0 : i32, i32
  }
  func.func @transform_1(%arg0: i32) -> (i32, i32) {
    %c0_i32 = arith.constant 0 : i32
    %c0_i32_0 = arith.constant 0 : i32
    %c0_i32_1 = arith.constant 0 : i32
    return %c0_i32, %c0_i32_0 : i32, i32
  }
}

</mosaic_0001>

<bundles_post_ra>
// kernel: tpu_custom_call.1
= control target key start
LH: loop header
LB: loop body
LE: loop exit
PB: predicated region body
PF: predicated region fallthrough
CT: control target
= control target key end

     0   :  { %6 = vsyncpa [#allocation3], 0  ;;  %s572_s0 = inlined_call_operand.hbm [shape: f32[8,256], index: 0, kind: input, shape index: {}]   ;;  %s573_s1 = inlined_call_operand.hbm [shape: f32[8,8], index: 1, kind: output, shape index: {}]  }
   0x1   :  { %8 = vsyncpa [#allocation3 + $0x1], 0 }
   0x2   :  { %9 = vsyncpa [#allocation4], 0  ;;  %s445_s6 = smov 0   ;;  %s447_s7 = smov 0  }
   0x3   :  { %s449_s8 = smov 0   ;;  %s451_s9 = smov 0  }
   0x4 LB: > { %s464_s10 = sadd.s32 4294967295, %s428_s9   ;;  %s467_s11 = sadd.s32 1, %s428_s9   ;;  %s428_s9 = sphi %s451_s9, %s581_s9   ;;  %s424_s8 = sphi %s449_s8, %s580_s8   ;;  %s420_s7 = sphi %s447_s7, %s579_s7   ;;  %s416_s6 = sphi %s445_s6, %s578_s6  }
   0x5   : > { %s19_s12 = ssub.s32 %s428_s9, %s467_s11  ;;  %s22_s13 = sadd.s32 1, %s424_s8 }
   0x6   : > { %p20_p0 = scmp.eq.s32.totalorder %s19_s12, 0  ;;  %p29_p1 = scmp.ne.s32.totalorder %s424_s8, %s420_s7 }
   0x7   : > { %p30_p2 = scmp.eq.s32.totalorder %s428_s9, 0  ;;  %p35_p3 = scmp.ne.s32.totalorder %s420_s7, %s416_s6 }
   0x8   : > { %s477_s14 = scalar_select %p20_p0, %s424_s8, %s22_s13  }
   0x9   : > { %p31_p4 = por %p30_p2, %p29_p1  ;;  %p36_p5 = scmp.eq.s32.totalorder %s464_s10, 0 }
   0xa   : > { %p295_p6 = scmp.lt.s32.totalorder %s428_s9, 2  ;;  %s80_s16 = sand.u32 1, %s424_s8  }
   0xb   : > { %p481_p7 = por %p36_p5, %p35_p3  ;;  %s268_s17 = sshll.u32 %s80_s16, 3 }
   0xc   : > { %s269_s18 = sshll.u32 %s428_s9, 7  ;;  %s84_s22 = scalar_lea.vmem [#allocation2], %s268_s17 }
   0xd   : > { %s490_s21 = scalar_lea.hbm %s572_s0, %s269_s18  ;;  %s91_s23 = sshll.u32 %s84_s22, 4  ;;  %s492_s23 = int_to_ptr.vmem [resolvable:$true] %s91_s23 }
   0xe   : > { %p494_p8 = pnand %p295_p6, %p31_p4  ;;  %s81_s25 = scalar_lea.sflag [#allocation3], %s80_s16 }
   0xf   : > { %s334_s26 = scalar_lea.hbm %s490_s21, 128  ;;  %s339_s29 = scalar_lea.hbm %s572_s0, 256 }
  0x10   : > { %p335_p11 = scmp.ne.s32.totalorder %s490_s21, %s334_s26  ;;  %p336_p12 = pneg %p494_p8 }
  0x11   : > { %p340_p1 = scmp.lt.u32.totalorder %s490_s21, %s572_s0  ;;  %p341_p2 = scmp.lt.u32.totalorder %s339_s29, %s334_s26 }
  0x12   : > { %p337_p13 = pnand %p336_p12, %p335_p11  ;;  %p343_p4 = scmp.lt.u32.totalorder %s334_s26, %s490_s21 }
  0x13   : > { %p342_p3 = por %p341_p2, %p340_p1 }
  0x14   : > { %p338_p0 = pneg %p337_p13 }
  0x15   : > { %p344_p5 = por %p343_p4, %p342_p3 }
  0x17   : > { %p345_p6 = pnand %p344_p5, %p338_p0 }
  0x19   : > { %348 = shalt.err (!%p345_p6)
}
  0x1a   : > { %s349_s3 = scalar_lea.vmem %s492_s23, 128  ;;  %s430_s4 = smov [#allocation2]  }
  0x1b   : > { %p350_p11 = scmp.ne.s32.totalorder %s492_s23, %s349_s3  ;;  %s354_s5 = sshll.u32 %s430_s4, 4  ;;  %s355_s5 = int_to_ptr.vmem [resolvable:$false] %s354_s5 }
  0x1c   : > { %s356_s6 = scalar_lea.vmem %s355_s5, 256  ;;  %p357_p10 = scmp.lt.s32.totalorder %s492_s23, %s355_s5 }
  0x1d   : > { %p352_p13 = pnand %p350_p11, %p336_p12  ;;  %p358_p1 = scmp.lt.s32.totalorder %s356_s6, %s349_s3 }
  0x1f   : > { %p353_p9 = pneg %p352_p13  ;;  %p359_p2 = por %p358_p1, %p357_p10 }
  0x21   : > { %p360_p3 = pnand %p359_p2, %p353_p9 }
  0x23   : > { %363 = shalt.err (!%p360_p3)
}
  0x24   : > { %294 = dma.hbm_to_vmem [thread:$0]  (!%p494_p8), %s490_s21, 128, %s492_s23, %s81_s25  }
  0x25   : > { %p576_p0 = scmp.lt.s32.totalorder %s428_s9, 3  ;;  %p577_p4 = scmp.ge.s32.totalorder %s428_s9, 1 }
  0x27   : > { %p97_p12 = pnand %p577_p4, %p576_p0 }
  0x28   : > { %s102_s12 = sand.u32 (!%p97_p12), 1, %s420_s7  }
  0x29   : > { %100 = sbr.rel (%p97_p12) target bundleno = 313 (0x139), region = 24  ;;  %s271_s13 = sshll.u32 (!%p97_p12), %s102_s12, 3 }
  0x2a   : > { %s103_s16 = scalar_lea.sflag (!%p97_p12), [#allocation3], %s102_s12  ;;  %s106_s17 = scalar_lea.vmem (!%p97_p12), [#allocation2], %s271_s13 }
  0x30   : > { %407 = dma.done.wait (%p481_p7), %s103_s16, 128  }
  0x31   : > { %409 = vsyncadd (%p481_p7), %s103_s16, 4294967168  ;;  %p272_p9 = scmp.ne.s32.totalorder %s464_s10, 0 }
  0x32   : > { %vm124_vm0 = vcmask (!%p272_p9), 64512   ;;  %v431_v0 = vmov (!%p272_p9), 0.0  }
  0x33   : > { %123 = sbr.rel (%p272_p9) target bundleno = 58 (0x3a), region = 32  ;;  %125 = vst.msk [vmem:[#allocation5] sm:$0xff] (!%p272_p9), %vm124_vm0, %v431_v0 }
  0x3a PF: > { %v126_v1 = vld [vmem:[%s106_s17] sm:$0xff]  ;;  %v432_v2 = vmov 0.0   ;;  %vm433_vm1 = vmmov 0   ;;  %v127_v3 = vld [vmem:[#allocation5] sm:$0xff]  ;;  %vm199_vm2 = vcmask 64512   ;;  %p273_p7 = scmp.ne.s32.totalorder %s464_s10, 1 }
  0x3b   : > { %280 = vmatprep.subr.mxu0 %v432_v2  ;;  %282 = vmatprep.mubr.msk.f32.mxu0 %vm433_vm1, %v432_v2 }
  0x3c   : > { %281 = vmatpush3.xpose.msra.mxu0 %v126_v1 }
  0x3f   : > { %283 = vmatmul.mubr.f32.vlgmr.msra.gmra.mrb[0].mxu0 %v126_v1 }
 0x10f   : > { %204 = sbr.rel (%p273_p7) target bundleno = 288 (0x120), region = 36 }
 0x112   : > { %v194_v4 = vpop.f32.mrb[0].mxu0 }
 0x113   : > { %v198_v5 = vadd.f32 %v194_v4, %v127_v3  ;;  %v284_v6 = vpop.f32.mrb[1].mxu0 }
 0x115   : > { %200 = vst.msk [vmem:[#allocation5] sm:$0xff] %vm199_vm2, %v198_v5 }
 0x11c   : > { %v205_v7 = vld [vmem:[#allocation5] sm:$0xff] }
 0x11d   : > { %v206_v8 = vmul.f32 0.00048828125, %v205_v7 }
 0x11f   : > { %207 = vst.msk [vmem:[#allocation5] sm:$0xff] %vm199_vm2, %v206_v8 }
 0x120 PF: > { %p296_p8 = scmp.eq.s32.totalorder %s464_s10, 1  ;;  %s434_s9 = smov [#allocation5]  }
 0x121   : > { %s215_s15 = sshll.u32 %s434_s9, 4  ;;  %s216_s15 = int_to_ptr.vmem [resolvable:$true] %s215_s15 }
 0x122   : > { %s364_s18 = scalar_lea.vmem %s216_s15, 128  ;;  %p371_p11 = scmp.lt.s32.totalorder %s216_s15, %s216_s15 }
 0x123   : > { %p365_p10 = scmp.ne.s32.totalorder %s216_s15, %s364_s18  ;;  %p372_p13 = scmp.lt.s32.totalorder %s364_s18, %s364_s18 }
 0x125   : > { %p366_p5 = pnand %p365_p10, %p296_p8  ;;  %p373_p1 = por %p372_p13, %p371_p11 }
 0x127   : > { %p367_p6 = pneg %p366_p5 }
 0x129   : > { %p374_p2 = pnand %p373_p1, %p367_p6 }
 0x12b   : > { %377 = shalt.err (!%p374_p2)
}
 0x12c   : > { %s378_s21 = scalar_lea.hbm %s573_s1, 128 }
 0x12d   : > { %p379_p3 = scmp.ne.s32.totalorder %s573_s1, %s378_s21  ;;  %p384_p12 = scmp.lt.u32.totalorder %s378_s21, %s573_s1 }
 0x12f   : > { %p380_p0 = pnand %p379_p3, %p296_p8 }
 0x131   : > { %p381_p4 = pneg %p380_p0 }
 0x133   : > { %p386_p9 = pnand %p384_p12, %p381_p4 }
 0x135   : > { %389 = shalt.err (!%p386_p9)
}
 0x136   : > { %288 = dma.vmem_to_hbm [thread:$0]  (%p296_p8), %s216_s15, 128, %s573_s1, [#allocation4]  }
 0x137   : > { %411 = dma.done.wait (%p296_p8), [#allocation4], 128  }
 0x138   : > { %413 = vsyncadd (%p296_p8), [#allocation4], 4294967168 }
 0x139 PF: > { %p12_p7 = scmp.ge.s32.totalorder %s467_s11, 4   ;;  %s578_s6 = smov %s420_s7 }
 0x13a   : > { %s579_s7 = smov %s424_s8  ;;  %s580_s8 = smov %s477_s14 }
 0x13b   : > { %s581_s9 = smov %s467_s11  ;;  %14 = sbr.rel (!%p12_p7) target bundleno = 4 (0x4), region = 69 }
 0x142   :  { %228 = vsyncpa [#allocation3], 1 }
 0x143   :  { %230 = vsyncpa [#allocation3 + $0x1], 1 }
 0x144   :  { %231 = vsyncpa [#allocation4], 1 }
 0x145   :  { %233 = vsyncpa [#allocation4 + $0x1], 1 }

</bundles_post_ra>
